<compile_context>
chip_gen: v6e
topology: v6e:2x2x1
jax: 0.10.0
libtpu: 0.0.40
codegen_flags: <defaults>
</compile_context>

<pallas_src>
import jax
import jax.numpy as jnp
from jax.experimental import pallas as pl
from jax.experimental.pallas import tpu as pltpu


def _layernorm(x, eps=1e-5):
    # torch.nn.LayerNorm default: gamma=1, beta=0, biased variance, eps=1e-5
    mu = jnp.mean(x, axis=-1, keepdims=True)
    var = jnp.mean((x - mu) ** 2, axis=-1, keepdims=True)
    return (x - mu) * jax.lax.rsqrt(var + eps)


def _leaky_relu(x, slope=0.2):
    return jnp.where(x > 0, x, slope * x)


def model_kernel(x1_ref, adj_ref, attn_ref, w_fused_ref, slab_ref, out_ref):
    f32 = jnp.float32
    B, N, _ = adj_ref.shape
    BN = B * N

    # ---- in-kernel bf16 cast of the big activation (no wrapper convert op) --
    x1 = x1_ref[...].astype(jnp.bfloat16)           # [B*N, 2048]
    attn_in = attn_ref[...]                         # [B*N, 8] f32

    # ---- unpack the packed small-parameter slab (single DMA, static slices) --
    b_fused = slab_ref[pl.ds(0, 1), pl.ds(0, 64)]               # [1, 64]
    b_gc1   = slab_ref[pl.ds(1, 1), pl.ds(0, 64)]               # [1, 64]
    b_gc2   = slab_ref[pl.ds(2, 1), pl.ds(0, 16)]               # [1, 16]
    b_proj  = slab_ref[pl.ds(3, 1), pl.ds(0, 8)]                # [1, 8] (cols 5:8 zero)
    b_fin   = slab_ref[pl.ds(4, 1), pl.ds(0, 8)][:, 0:1]        # [1, 1]
    w_gc2   = slab_ref[pl.ds(8, 64), pl.ds(0, 16)]              # [64, 16]
    w_pa    = slab_ref[pl.ds(72, 16), pl.ds(0, 8)]              # [16, 8] (cols 5:8 zero)
    w_pb    = slab_ref[pl.ds(88, 8), pl.ds(0, 8)]               # [8, 8]

    # ---- block-diagonal adjacency: keeps everything 2-D (no [B,N,D] repacks) --
    adj3 = adj_ref[...].astype(f32)                 # adj.float()
    zero_blk = jnp.zeros((N, N), f32)
    adj_bd = jnp.concatenate(
        [jnp.concatenate(
            [adj3[b] if c == b else zero_blk for c in range(B)], axis=1)
         for b in range(B)], axis=0)                # [B*N, B*N]

    # ---- fused fc1 + gc1-support: one bf16 MXU matmul, f32 accumulate ----
    support1 = jnp.dot(x1, w_fused_ref[...],
                       preferred_element_type=f32) + b_fused     # [B*N, 64]
    g1 = jnp.dot(adj_bd, support1, preferred_element_type=f32) + b_gc1
    g1 = _leaky_relu(_layernorm(g1))                # [B*N, 64]

    # ---- GCN layer 2: 64 -> 16 ----
    support2 = jnp.dot(g1, w_gc2, preferred_element_type=f32)
    g2 = jnp.dot(adj_bd, support2, preferred_element_type=f32) + b_gc2
    g2 = _leaky_relu(_layernorm(g2))                # [B*N, 16]

    # ---- fc2 (+ attention-score + fc_final projections, all folded) ----
    # cols 0:4 = x2 @ W_att + b_att  (softmax logits), col 4 = x2 @ W_fin^T
    proj = (jnp.dot(g2, w_pa, preferred_element_type=f32)
            + jnp.dot(attn_in, w_pb, preferred_element_type=f32)
            + b_proj)                               # [B*N, 8]

    scores = proj[:, 0:4].reshape(B, N, 4)          # [B, N, 4]
    x2fin = proj[:, 4:5].reshape(B, N, 1)           # [B, N, 1]

    # softmax over the node axis (dim 1), numerically stable
    scores = scores - jnp.max(scores, axis=1, keepdims=True)
    e = jnp.exp(scores)
    att = e / jnp.sum(e, axis=1, keepdims=True)     # [B, N, 4]
    att_mean = jnp.mean(att, axis=-1, keepdims=True)            # [B, N, 1]

    # pooled head:  sum_n mean_h(att) * (x2 @ W_fin^T)  ==  fc_final(mean-head att^T x2)
    o = jnp.sum(att_mean * x2fin, axis=1) + b_fin   # [B, 1]
    out_ref[...] = jnp.tanh(o)


def prepare_kernel_params(params):
    """Host-side, ONCE per weight set: fuse fc1*gc1 (bf16) and pack the rest
    (with the attention-score and fc_final projections pre-folded into fc2)
    into a single contiguous f32 slab."""
    (w_fc1, b_fc1, w_gc1, b_gc1, w_gc2, b_gc2,
     w_fc2a, w_fc2b, b_fc2, w_att, b_att, w_fin, b_fin) = params

    w_fused = (w_fc1 @ w_gc1).astype(jnp.bfloat16)              # [2048, 64]
    b_fused = (b_fc1.reshape(1, -1) @ w_gc1).reshape(-1)        # [64]

    # Fold: scores = x2 @ W_att + b_att ; x2fin = x2 @ W_fin^T
    # with x2 = g2 @ w_fc2a + attn @ w_fc2b + b_fc2
    w_fin_col = w_fin.reshape(-1, 1)                            # [16, 1]
    b_fc2v = b_fc2.reshape(1, -1)                               # [1, 16]
    b_attv = b_att.reshape(1, -1)                               # [1, 4]

    def pad8(m):
        return jnp.pad(m, ((0, 0), (0, 8 - m.shape[1])))

    w_pa = pad8(jnp.concatenate([w_fc2a @ w_att, w_fc2a @ w_fin_col], axis=1))  # [16, 8]
    w_pb = pad8(jnp.concatenate([w_fc2b @ w_att, w_fc2b @ w_fin_col], axis=1))  # [8, 8]
    b_proj = pad8(jnp.concatenate([b_fc2v @ w_att + b_attv,
                                   b_fc2v @ w_fin_col], axis=1)).reshape(-1)    # [8]

    slab = jnp.zeros((96, 64), jnp.float32)
    slab = slab.at[0, :64].set(b_fused)
    slab = slab.at[1, :64].set(b_gc1.reshape(-1))
    slab = slab.at[2, :16].set(b_gc2.reshape(-1))
    slab = slab.at[3, :8].set(b_proj)
    slab = slab.at[4, 0].set(jnp.squeeze(b_fin))
    slab = slab.at[8:72, :16].set(w_gc2)
    slab = slab.at[72:88, :8].set(w_pa)
    slab = slab.at[88:96, :8].set(w_pb)
    return (w_fused, slab)


def model_forward(x1, adj, attn, kernel_params):
    B, N, K = x1.shape
    w_fused, slab = kernel_params
    vspec = pl.BlockSpec(memory_space=pltpu.MemorySpace.VMEM)
    args = (x1.reshape(B * N, K), adj, attn.reshape(B * N, attn.shape[-1]),
            w_fused, slab)
    return pl.pallas_call(
        model_kernel,
        out_shape=jax.ShapeDtypeStruct((B, 1), jnp.float32),
        in_specs=[vspec] * len(args),
        out_specs=vspec,
        compiler_params=pltpu.CompilerParams(vmem_limit_bytes=8 << 20),
    )(*args)


def model_reference(x1, adj, attn, params):
    """Unfused f32 reference, mirrors the PyTorch forward (eval mode)."""
    (w_fc1, b_fc1, w_gc1, b_gc1, w_gc2, b_gc2,
     w_fc2a, w_fc2b, b_fc2, w_att, b_att, w_fin, b_fin) = params
    h = jnp.einsum('bnk,kd->bnd', x1, w_fc1) + b_fc1
    g1 = jnp.einsum('bnm,bmd->bnd', adj, jnp.einsum('bnk,kd->bnd', h, w_gc1)) + b_gc1
    g1 = _leaky_relu(_layernorm(g1))
    g2 = jnp.einsum('bnm,bmd->bnd', adj, jnp.einsum('bnk,kd->bnd', g1, w_gc2)) + b_gc2
    g2 = _leaky_relu(_layernorm(g2))
    x2 = (jnp.einsum('bnk,kd->bnd', g2, w_fc2a)
          + jnp.einsum('bnk,kd->bnd', attn, w_fc2b) + b_fc2)
    scores = jnp.einsum('bnk,kh->bnh', x2, w_att) + b_att
    att = jax.nn.softmax(scores, axis=1)
    nfe = jnp.einsum('bnh,bnd->bhd', att, x2)
    nfe_avg = jnp.sum(nfe, axis=1) / att.shape[-1]
    o = jnp.sum(nfe_avg * w_fin, axis=-1, keepdims=True) + b_fin
    return jnp.tanh(o)


def init_params(key):
    def u(k, shape, fan):
        s = 1.0 / jnp.sqrt(jnp.float32(fan))
        return jax.random.uniform(k, shape, jnp.float32, -s, s)

    ks = jax.random.split(key, 13)
    w_fc1 = u(ks[0], (2048, 256), 2048); b_fc1 = u(ks[1], (1, 1, 256), 2048)
    w_gc1 = u(ks[2], (256, 64), 64);     b_gc1 = u(ks[3], (1, 1, 64), 64)
    w_gc2 = u(ks[4], (64, 16), 16);      b_gc2 = u(ks[5], (1, 1, 16), 16)
    w_fc2a = u(ks[6], (16, 16), 24)      # rows 0:16 of fc2 weight (GCN output part)
    w_fc2b = u(ks[7], (8, 16), 24)       # rows 16:24 of fc2 weight (attention input part)
    b_fc2 = u(ks[8], (1, 1, 16), 24)
    w_att = u(ks[9], (16, 4), 16);       b_att = u(ks[10], (1, 1, 4), 16)
    w_fin = u(ks[11], (1, 16), 16);      b_fin = u(ks[12], (1, 1), 16)
    # LayerNorm params are the torch defaults (gamma=1, beta=0), baked into _layernorm.
    return (w_fc1, b_fc1, w_gc1, b_gc1, w_gc2, b_gc2,
            w_fc2a, w_fc2b, b_fc2, w_att, b_att, w_fin, b_fin)


if __name__ == "__main__":
    B, N = 2, 8
    key = jax.random.PRNGKey(0)
    k_x, k_adj, k_att, k_p = jax.random.split(key, 4)

    x1 = jax.random.normal(k_x, (B, N, 2048), jnp.float32)
    adj = jax.random.uniform(k_adj, (B, N, N), jnp.float32)      # adj.float()
    attention = jax.random.normal(k_att, (B, N, 8), jnp.float32)
    params = init_params(k_p)
    kernel_params = prepare_kernel_params(params)   # fusion + packing, once

    forward = jax.jit(model_forward)
    out = jax.block_until_ready(forward(x1, adj, attention, kernel_params))
    ref = jax.block_until_ready(model_reference(x1, adj, attention, params))

    assert out.shape == (B, 1)
    assert jnp.allclose(out, ref, rtol=2e-2, atol=2e-2), (out, ref)

    print("KERNEL_OK")
</pallas_src>

<mosaic_0001>
module attributes {stable_mosaic.version = 11 : i64} {
  func.func @model_kernel(%arg0: memref<16x2048xf32, #tpu.memory_space<vmem>>, %arg1: memref<2x8x8xf32, #tpu.memory_space<vmem>>, %arg2: memref<16x8xf32, #tpu.memory_space<vmem>>, %arg3: memref<2048x64xbf16, #tpu.memory_space<vmem>>, %arg4: memref<96x64xf32, #tpu.memory_space<vmem>>, %arg5: memref<2x1xf32, #tpu.memory_space<vmem>>) attributes {dimension_semantics = [], scalar_prefetch = 0 : i64, scratch_operands = 0 : i64, tpu.core_type = #tpu.core_type<tc>} {
    %c0 = arith.constant 0 : index
    %c0_0 = arith.constant 0 : index
    %0 = vector.load %arg0[%c0, %c0_0] : memref<16x2048xf32, #tpu.memory_space<vmem>>, vector<16x2048xf32>
    %1 = arith.truncf %0 : vector<16x2048xf32> to vector<16x2048xbf16>
    %c0_1 = arith.constant 0 : index
    %c0_2 = arith.constant 0 : index
    %2 = vector.load %arg2[%c0_1, %c0_2] : memref<16x8xf32, #tpu.memory_space<vmem>>, vector<16x8xf32>
    %c0_3 = arith.constant 0 : index
    %c0_4 = arith.constant 0 : index
    %3 = vector.load %arg4[%c0_3, %c0_4] : memref<96x64xf32, #tpu.memory_space<vmem>>, vector<1x64xf32>
    %c1 = arith.constant 1 : index
    %c0_5 = arith.constant 0 : index
    %4 = vector.load %arg4[%c1, %c0_5] : memref<96x64xf32, #tpu.memory_space<vmem>>, vector<1x64xf32>
    %c2 = arith.constant 2 : index
    %c0_6 = arith.constant 0 : index
    %5 = vector.load %arg4[%c2, %c0_6] : memref<96x64xf32, #tpu.memory_space<vmem>>, vector<1x16xf32>
    %c3 = arith.constant 3 : index
    %c0_7 = arith.constant 0 : index
    %6 = vector.load %arg4[%c3, %c0_7] : memref<96x64xf32, #tpu.memory_space<vmem>>, vector<1x8xf32>
    %c4 = arith.constant 4 : index
    %c0_8 = arith.constant 0 : index
    %7 = vector.load %arg4[%c4, %c0_8] : memref<96x64xf32, #tpu.memory_space<vmem>>, vector<1x8xf32>
    %8 = vector.extract_strided_slice %7 {offsets = [0, 0], sizes = [1, 1], strides = [1, 1]} : vector<1x8xf32> to vector<1x1xf32>
    %c8 = arith.constant 8 : index
    %c0_9 = arith.constant 0 : index
    %9 = vector.load %arg4[%c8, %c0_9] : memref<96x64xf32, #tpu.memory_space<vmem>>, vector<64x16xf32>
    %c72 = arith.constant 72 : index
    %c0_10 = arith.constant 0 : index
    %10 = vector.load %arg4[%c72, %c0_10] : memref<96x64xf32, #tpu.memory_space<vmem>>, vector<16x8xf32>
    %c88 = arith.constant 88 : index
    %c0_11 = arith.constant 0 : index
    %11 = vector.load %arg4[%c88, %c0_11] : memref<96x64xf32, #tpu.memory_space<vmem>>, vector<8x8xf32>
    %c0_12 = arith.constant 0 : index
    %c0_13 = arith.constant 0 : index
    %c0_14 = arith.constant 0 : index
    %12 = vector.load %arg1[%c0_12, %c0_13, %c0_14] : memref<2x8x8xf32, #tpu.memory_space<vmem>>, vector<2x8x8xf32>
    %cst = arith.constant 0.000000e+00 : f32
    %13 = vector.broadcast %cst : f32 to vector<8x8xf32>
    %14 = vector.extract_strided_slice %12 {offsets = [0, 0, 0], sizes = [1, 8, 8], strides = [1, 1, 1]} : vector<2x8x8xf32> to vector<1x8x8xf32>
    %15 = vector.shape_cast %14 : vector<1x8x8xf32> to vector<8x8xf32>
    %16 = tpu.concatenate %15, %13 in 1 : vector<8x8xf32>, vector<8x8xf32> -> vector<8x16xf32>
    %17 = vector.extract_strided_slice %12 {offsets = [1, 0, 0], sizes = [1, 8, 8], strides = [1, 1, 1]} : vector<2x8x8xf32> to vector<1x8x8xf32>
    %18 = vector.shape_cast %17 : vector<1x8x8xf32> to vector<8x8xf32>
    %19 = tpu.concatenate %13, %18 in 1 : vector<8x8xf32>, vector<8x8xf32> -> vector<8x16xf32>
    %20 = tpu.concatenate %16, %19 in 0 : vector<8x16xf32>, vector<8x16xf32> -> vector<16x16xf32>
    %c0_15 = arith.constant 0 : index
    %c0_16 = arith.constant 0 : index
    %21 = vector.load %arg3[%c0_15, %c0_16] : memref<2048x64xbf16, #tpu.memory_space<vmem>>, vector<2048x64xbf16>
    %cst_17 = arith.constant dense<0.000000e+00> : vector<16x64xf32>
    %22 = tpu.matmul %1, %21, %cst_17 {dimension_numbers = #tpu.dot_dimension_numbers<[1], [0], [0], [1], [0, 0, 1, 1], [], []>} : vector<16x2048xbf16>, vector<2048x64xbf16>, vector<16x64xf32> -> vector<16x64xf32>
    %23 = vector.broadcast %3 : vector<1x64xf32> to vector<16x64xf32>
    %24 = arith.addf %22, %23 : vector<16x64xf32>
    %cst_18 = arith.constant dense<0.000000e+00> : vector<16x64xf32>
    %25 = tpu.matmul %20, %24, %cst_18 {dimension_numbers = #tpu.dot_dimension_numbers<[1], [0], [0], [1], [0, 0, 1, 1], [], []>} : vector<16x16xf32>, vector<16x64xf32>, vector<16x64xf32> -> vector<16x64xf32>
    %26 = vector.broadcast %4 : vector<1x64xf32> to vector<16x64xf32>
    %27 = arith.addf %25, %26 : vector<16x64xf32>
    %cst_19 = arith.constant dense<0.000000e+00> : vector<16xf32>
    %28 = vector.multi_reduction <add>, %27, %cst_19 [1] : vector<16x64xf32> to vector<16xf32>
    %29 = vector.shape_cast %28 : vector<16xf32> to vector<16x1xf32>
    %cst_20 = arith.constant 6.400000e+01 : f32
    %30 = vector.broadcast %cst_20 : f32 to vector<16x1xf32>
    %31 = arith.divf %29, %30 : vector<16x1xf32>
    %32 = vector.broadcast %31 : vector<16x1xf32> to vector<16x64xf32>
    %33 = arith.subf %27, %32 : vector<16x64xf32>
    %34 = arith.mulf %33, %33 : vector<16x64xf32>
    %cst_21 = arith.constant dense<0.000000e+00> : vector<16xf32>
    %35 = vector.multi_reduction <add>, %34, %cst_21 [1] : vector<16x64xf32> to vector<16xf32>
    %36 = vector.shape_cast %35 : vector<16xf32> to vector<16x1xf32>
    %cst_22 = arith.constant 6.400000e+01 : f32
    %37 = vector.broadcast %cst_22 : f32 to vector<16x1xf32>
    %38 = arith.divf %36, %37 : vector<16x1xf32>
    %39 = vector.broadcast %31 : vector<16x1xf32> to vector<16x64xf32>
    %40 = arith.subf %27, %39 : vector<16x64xf32>
    %cst_23 = arith.constant 9.99999974E-6 : f32
    %41 = vector.broadcast %cst_23 : f32 to vector<16x1xf32>
    %42 = arith.addf %38, %41 : vector<16x1xf32>
    %43 = math.rsqrt %42 : vector<16x1xf32>
    %44 = vector.broadcast %43 : vector<16x1xf32> to vector<16x64xf32>
    %45 = arith.mulf %40, %44 : vector<16x64xf32>
    %cst_24 = arith.constant 0.000000e+00 : f32
    %46 = vector.broadcast %cst_24 : f32 to vector<16x64xf32>
    %47 = arith.cmpf ogt, %45, %46 : vector<16x64xf32>
    %cst_25 = arith.constant 2.000000e-01 : f32
    %48 = vector.broadcast %cst_25 : f32 to vector<16x64xf32>
    %49 = arith.mulf %48, %45 : vector<16x64xf32>
    %50 = arith.select %47, %45, %49 : vector<16x64xi1>, vector<16x64xf32>
    %cst_26 = arith.constant dense<0.000000e+00> : vector<16x16xf32>
    %51 = tpu.matmul %50, %9, %cst_26 {dimension_numbers = #tpu.dot_dimension_numbers<[1], [0], [0], [1], [0, 0, 1, 1], [], []>} : vector<16x64xf32>, vector<64x16xf32>, vector<16x16xf32> -> vector<16x16xf32>
    %cst_27 = arith.constant dense<0.000000e+00> : vector<16x16xf32>
    %52 = tpu.matmul %20, %51, %cst_27 {dimension_numbers = #tpu.dot_dimension_numbers<[1], [0], [0], [1], [0, 0, 1, 1], [], []>} : vector<16x16xf32>, vector<16x16xf32>, vector<16x16xf32> -> vector<16x16xf32>
    %53 = vector.broadcast %5 : vector<1x16xf32> to vector<16x16xf32>
    %54 = arith.addf %52, %53 : vector<16x16xf32>
    %cst_28 = arith.constant dense<0.000000e+00> : vector<16xf32>
    %55 = vector.multi_reduction <add>, %54, %cst_28 [1] : vector<16x16xf32> to vector<16xf32>
    %56 = vector.shape_cast %55 : vector<16xf32> to vector<16x1xf32>
    %cst_29 = arith.constant 1.600000e+01 : f32
    %57 = vector.broadcast %cst_29 : f32 to vector<16x1xf32>
    %58 = arith.divf %56, %57 : vector<16x1xf32>
    %59 = vector.broadcast %58 : vector<16x1xf32> to vector<16x16xf32>
    %60 = arith.subf %54, %59 : vector<16x16xf32>
    %61 = arith.mulf %60, %60 : vector<16x16xf32>
    %cst_30 = arith.constant dense<0.000000e+00> : vector<16xf32>
    %62 = vector.multi_reduction <add>, %61, %cst_30 [1] : vector<16x16xf32> to vector<16xf32>
    %63 = vector.shape_cast %62 : vector<16xf32> to vector<16x1xf32>
    %cst_31 = arith.constant 1.600000e+01 : f32
    %64 = vector.broadcast %cst_31 : f32 to vector<16x1xf32>
    %65 = arith.divf %63, %64 : vector<16x1xf32>
    %66 = vector.broadcast %58 : vector<16x1xf32> to vector<16x16xf32>
    %67 = arith.subf %54, %66 : vector<16x16xf32>
    %cst_32 = arith.constant 9.99999974E-6 : f32
    %68 = vector.broadcast %cst_32 : f32 to vector<16x1xf32>
    %69 = arith.addf %65, %68 : vector<16x1xf32>
    %70 = math.rsqrt %69 : vector<16x1xf32>
    %71 = vector.broadcast %70 : vector<16x1xf32> to vector<16x16xf32>
    %72 = arith.mulf %67, %71 : vector<16x16xf32>
    %cst_33 = arith.constant 0.000000e+00 : f32
    %73 = vector.broadcast %cst_33 : f32 to vector<16x16xf32>
    %74 = arith.cmpf ogt, %72, %73 : vector<16x16xf32>
    %cst_34 = arith.constant 2.000000e-01 : f32
    %75 = vector.broadcast %cst_34 : f32 to vector<16x16xf32>
    %76 = arith.mulf %75, %72 : vector<16x16xf32>
    %77 = arith.select %74, %72, %76 : vector<16x16xi1>, vector<16x16xf32>
    %cst_35 = arith.constant dense<0.000000e+00> : vector<16x8xf32>
    %78 = tpu.matmul %77, %10, %cst_35 {dimension_numbers = #tpu.dot_dimension_numbers<[1], [0], [0], [1], [0, 0, 1, 1], [], []>} : vector<16x16xf32>, vector<16x8xf32>, vector<16x8xf32> -> vector<16x8xf32>
    %cst_36 = arith.constant dense<0.000000e+00> : vector<16x8xf32>
    %79 = tpu.matmul %2, %11, %cst_36 {dimension_numbers = #tpu.dot_dimension_numbers<[1], [0], [0], [1], [0, 0, 1, 1], [], []>} : vector<16x8xf32>, vector<8x8xf32>, vector<16x8xf32> -> vector<16x8xf32>
    %80 = arith.addf %78, %79 : vector<16x8xf32>
    %81 = vector.broadcast %6 : vector<1x8xf32> to vector<16x8xf32>
    %82 = arith.addf %80, %81 : vector<16x8xf32>
    %83 = vector.extract_strided_slice %82 {offsets = [0, 0], sizes = [16, 4], strides = [1, 1]} : vector<16x8xf32> to vector<16x4xf32>
    %84 = vector.shape_cast %83 : vector<16x4xf32> to vector<2x8x4xf32>
    %85 = vector.extract_strided_slice %82 {offsets = [0, 4], sizes = [16, 1], strides = [1, 1]} : vector<16x8xf32> to vector<16x1xf32>
    %86 = vector.shape_cast %85 : vector<16x1xf32> to vector<2x8x1xf32>
    %cst_37 = arith.constant dense<0xFF800000> : vector<2x4xf32>
    %87 = vector.multi_reduction <maximumf>, %84, %cst_37 [1] : vector<2x8x4xf32> to vector<2x4xf32>
    %88 = vector.shape_cast %87 : vector<2x4xf32> to vector<2x1x4xf32>
    %89 = vector.broadcast %88 : vector<2x1x4xf32> to vector<2x8x4xf32>
    %90 = arith.subf %84, %89 : vector<2x8x4xf32>
    %91 = math.exp %90 : vector<2x8x4xf32>
    %cst_38 = arith.constant dense<0.000000e+00> : vector<2x4xf32>
    %92 = vector.multi_reduction <add>, %91, %cst_38 [1] : vector<2x8x4xf32> to vector<2x4xf32>
    %93 = vector.shape_cast %92 : vector<2x4xf32> to vector<2x1x4xf32>
    %94 = vector.broadcast %93 : vector<2x1x4xf32> to vector<2x8x4xf32>
    %95 = arith.divf %91, %94 : vector<2x8x4xf32>
    %cst_39 = arith.constant dense<0.000000e+00> : vector<2x8xf32>
    %96 = vector.multi_reduction <add>, %95, %cst_39 [2] : vector<2x8x4xf32> to vector<2x8xf32>
    %97 = vector.shape_cast %96 : vector<2x8xf32> to vector<2x8x1xf32>
    %cst_40 = arith.constant 4.000000e+00 : f32
    %98 = vector.broadcast %cst_40 : f32 to vector<2x8x1xf32>
    %99 = arith.divf %97, %98 : vector<2x8x1xf32>
    %100 = arith.mulf %99, %86 : vector<2x8x1xf32>
    %cst_41 = arith.constant dense<0.000000e+00> : vector<2x1xf32>
    %101 = vector.multi_reduction <add>, %100, %cst_41 [1] : vector<2x8x1xf32> to vector<2x1xf32>
    %102 = vector.broadcast %8 : vector<1x1xf32> to vector<2x1xf32>
    %103 = arith.addf %101, %102 : vector<2x1xf32>
    %104 = math.tanh %103 : vector<2x1xf32>
    %c0_42 = arith.constant 0 : index
    %c0_43 = arith.constant 0 : index
    %105 = vector.load %arg5[%c0_42, %c0_43] : memref<2x1xf32, #tpu.memory_space<vmem>>, vector<2x1xf32>
    tpu.vector_store %arg5[%c0_42, %c0_43], %104 {strides = array<i32>} : memref<2x1xf32, #tpu.memory_space<vmem>>, vector<2x1xf32>,
    return
  }
}

</mosaic_0001>

<bundles_post_ra>
// kernel: model_forward.1
= control target key start
LH: loop header
LB: loop body
LE: loop exit
PB: predicated region body
PF: predicated region fallthrough
CT: control target
= control target key end

     0   :  { %s2564_s14 = smov 8   ;;  %vm89_vm0 = vcmask 64512   ;;  %vm1456_vm1 = vcmask 130048   ;;  %vm1538_vm2 = vcmask 523264   ;;  %s2565_s20 = smov 4   ;;  %vm1933_vm7 = vcmask 31744   ;;  %s3174_s3 = inlined_call_operand.vmem [shape: bf16[2048,64], index: 3, kind: input, shape index: {}]   ;;  %s3175_s0 = inlined_call_operand.vmem [shape: f32[16,2048], index: 0, kind: input, shape index: {}]   ;;  %s3176_s1 = inlined_call_operand.vmem [shape: f32[2,8,8], index: 1, kind: input, shape index: {}]   ;;  %s3177_s4 = inlined_call_operand.vmem [shape: f32[96,64], index: 4, kind: input, shape index: {}]   ;;  %s3178_s2 = inlined_call_operand.vmem [shape: f32[16,8], index: 2, kind: input, shape index: {}]   ;;  %s3179_s5 = inlined_call_operand.vmem [shape: f32[2,1], index: 5, kind: output, shape index: {}]  }
   0x1   :  { %v2416_v0 = vld [vmem:[%s3174_s3 + $0x78] sm:$0xff]   ;;  %v2420_v4 = vld [vmem:[%s3174_s3 + $0x70] sm:$0xff]   ;;  %v2424_v8 = vld [vmem:[%s3174_s3 + $0x68] sm:$0xff]   ;;  %vm1983_vm8 = vcmask 39968   ;;  %vm2013_vm9 = vcmask 1041409   ;;  %vm2018_vm10 = vcmask 1024  }
   0x2   :  { %v2417_v1 = vld [vmem:[%s3174_s3 + $0xf8] sm:$0xff]   ;;  %2167 = vmatprep.subr.bf16.mxu0 %v2416_v0  ;;  %v2421_v5 = vld [vmem:[%s3174_s3 + $0xf0] sm:$0xff]   ;;  %v2425_v9 = vld [vmem:[%s3174_s3 + $0xe8] sm:$0xff]  }
   0x3   :  { %v2418_v2 = vld [vmem:[%s3174_s3 + $0x38] sm:$0xff]   ;;  %2189 = vmatprep.subr.bf16.mxu1 %v2417_v1  ;;  %v2422_v6 = vld [vmem:[%s3174_s3 + $0x30] sm:$0xff]   ;;  %v2426_v10 = vld [vmem:[%s3174_s3 + $0x28] sm:$0xff]  }
   0x4   :  { %v2419_v3 = vld [vmem:[%s3174_s3 + $0xb8] sm:$0xff]   ;;  %2168 = vmatpush3.bf16.msra.mxu0 %v2418_v2  ;;  %v2423_v7 = vld [vmem:[%s3174_s3 + $0xb0] sm:$0xff]   ;;  %v2427_v11 = vld [vmem:[%s3174_s3 + $0xa8] sm:$0xff]  }
   0x5   :  { %2190 = vmatpush3.bf16.msra.mxu1 %v2419_v3  ;;  %2169 = vmatprep.subr.bf16.mxu0 %v2420_v4  ;;  %v2428_v12 = vld [vmem:[%s3174_s3 + $0x60] sm:$0xff]   ;;  %v2432_v16 = vld [vmem:[%s3174_s3 + $0x58] sm:$0xff]   ;;  %v2436_v20 = vld [vmem:[%s3174_s3 + $0x50] sm:$0xff]  }
   0x6   :  { %2191 = vmatprep.subr.bf16.mxu1 %v2421_v5  ;;  %v2429_v13 = vld [vmem:[%s3174_s3 + $0xe0] sm:$0xff]   ;;  %v2433_v17 = vld [vmem:[%s3174_s3 + $0xd8] sm:$0xff]   ;;  %v2437_v21 = vld [vmem:[%s3174_s3 + $0xd0] sm:$0xff]  }
   0x7   :  { %v2430_v14 = vld [vmem:[%s3174_s3 + $0x20] sm:$0xff]   ;;  %v2434_v18 = vld [vmem:[%s3174_s3 + $0x18] sm:$0xff]   ;;  %v2438_v22 = vld [vmem:[%s3174_s3 + $0x10] sm:$0xff]  }
   0x8   :  { %2170 = vmatpush3.bf16.msra.mxu0 %v2422_v6  ;;  %v2431_v15 = vld [vmem:[%s3174_s3 + $0xa0] sm:$0xff]   ;;  %v2435_v19 = vld [vmem:[%s3174_s3 + $0x98] sm:$0xff]   ;;  %v2439_v23 = vld [vmem:[%s3174_s3 + $0x90] sm:$0xff]  }
   0x9   :  { %2192 = vmatpush3.bf16.msra.mxu1 %v2423_v7  ;;  %2171 = vmatprep.subr.bf16.mxu0 %v2424_v8  ;;  %v2440_v24 = vld [vmem:[%s3174_s3 + $0x48] sm:$0xff]   ;;  %v2444_v28 = vld [vmem:[%s3174_s3 + $0x40] sm:$0xff]   ;;  %v24_v34 = vld [vmem:[%s3175_s0 + $0x18] sm:$0xff] }
   0xa   :  { %2193 = vmatprep.subr.bf16.mxu1 %v2425_v9  ;;  %v2441_v25 = vld [vmem:[%s3174_s3 + $0xc8] sm:$0xff]   ;;  %v2445_v29 = vld [vmem:[%s3174_s3 + $0xc0] sm:$0xff]   ;;  %v40_v36 = vld [vmem:[%s3175_s0 + $0x98] sm:$0xff] }
   0xb   :  { %v2442_v26 = vld [vmem:[%s3174_s3 + $0x8] sm:$0xff]   ;;  %v2446_v30 = vld [vmem:[%s3174_s3] sm:$0xff]   ;;  %v56_v39 = vpack.c.bf16 %v40_v36, %v24_v34  ;;  %v23_v41 = vld [vmem:[%s3175_s0 + $0x10] sm:$0xff] }
   0xc   :  { %2172 = vmatpush3.bf16.msra.mxu0 %v2426_v10  ;;  %v2443_v27 = vld [vmem:[%s3174_s3 + $0x88] sm:$0xff]   ;;  %v2447_v31 = vld [vmem:[%s3174_s3 + $0x80] sm:$0xff]   ;;  %v39_v42 = vld [vmem:[%s3175_s0 + $0x90] sm:$0xff] }
   0xd   :  { %2194 = vmatpush3.bf16.msra.mxu1 %v2427_v11  ;;  %2173 = vmatprep.subr.bf16.mxu0 %v2428_v12  ;;  %v22_v32 = vld [vmem:[%s3175_s0 + $0x8] sm:$0xff]  ;;  %v21_v37 = vld [vmem:[%s3175_s0] sm:$0xff]  ;;  %v55_v43 = vpack.c.bf16 %v39_v42, %v23_v41  ;;  %v2448_v44 = vld [vmem:[%s3174_s3 + $0x178] sm:$0xff]  }
   0xe   :  { %2195 = vmatprep.subr.bf16.mxu1 %v2429_v13  ;;  %v38_v33 = vld [vmem:[%s3175_s0 + $0x88] sm:$0xff]  ;;  %v37_v38 = vld [vmem:[%s3175_s0 + $0x80] sm:$0xff]  ;;  %1197 = vmatprep.mubr.bf16.mxu1 %v56_v39  ;;  %v2449_v45 = vld [vmem:[%s3174_s3 + $0x1f8] sm:$0xff]  }
   0xf   :  { %v54_v35 = vpack.c.bf16 %v38_v33, %v22_v32  ;;  %v53_v40 = vpack.c.bf16 %v37_v38, %v21_v37  ;;  %v2450_v46 = vld [vmem:[%s3174_s3 + $0x138] sm:$0xff]   ;;  %v2452_v48 = vld [vmem:[%s3174_s3 + $0x170] sm:$0xff]   ;;  %v2456_v52 = vld [vmem:[%s3174_s3 + $0x168] sm:$0xff]  }
  0x10   :  { %2174 = vmatpush3.bf16.msra.mxu0 %v2430_v14  ;;  %v2451_v47 = vld [vmem:[%s3174_s3 + $0x1b8] sm:$0xff]   ;;  %v2453_v49 = vld [vmem:[%s3174_s3 + $0x1f0] sm:$0xff]   ;;  %v2457_v53 = vld [vmem:[%s3174_s3 + $0x1e8] sm:$0xff]  }
  0x11   :  { %2196 = vmatpush3.bf16.msra.mxu1 %v2431_v15  ;;  %2175 = vmatprep.subr.bf16.mxu0 %v2432_v16  ;;  %v2454_v50 = vld [vmem:[%s3174_s3 + $0x130] sm:$0xff]   ;;  %v2458_v54 = vld [vmem:[%s3174_s3 + $0x128] sm:$0xff]   ;;  %v2460_v56 = vld [vmem:[%s3174_s3 + $0x160] sm:$0xff]  }
  0x12   :  { %2197 = vmatprep.subr.bf16.mxu1 %v2433_v17  ;;  %1156 = vmatprep.mubr.bf16.mxu0 %v54_v35  ;;  %v2455_v51 = vld [vmem:[%s3174_s3 + $0x1b0] sm:$0xff]   ;;  %v2459_v55 = vld [vmem:[%s3174_s3 + $0x1a8] sm:$0xff]   ;;  %v2461_v57 = vld [vmem:[%s3174_s3 + $0x1e0] sm:$0xff]  }
  0x13   :  { %v2462_v58 = vld [vmem:[%s3174_s3 + $0x120] sm:$0xff]   ;;  %v2464_v60 = vld [vmem:[%s3174_s3 + $0x158] sm:$0xff]   ;;  %v2468_v0 = vld [vmem:[%s3174_s3 + $0x150] sm:$0xff]  }
  0x14   :  { %2176 = vmatpush3.bf16.msra.mxu0 %v2434_v18  ;;  %v2463_v59 = vld [vmem:[%s3174_s3 + $0x1a0] sm:$0xff]   ;;  %v2465_v61 = vld [vmem:[%s3174_s3 + $0x1d8] sm:$0xff]   ;;  %v2469_v1 = vld [vmem:[%s3174_s3 + $0x1d0] sm:$0xff]  }
  0x15   :  { %2198 = vmatpush3.bf16.msra.mxu1 %v2435_v19  ;;  %2177 = vmatprep.subr.bf16.mxu0 %v2436_v20  ;;  %v2466_v62 = vld [vmem:[%s3174_s3 + $0x118] sm:$0xff]   ;;  %v2470_v2 = vld [vmem:[%s3174_s3 + $0x110] sm:$0xff]   ;;  %v2472_v4 = vld [vmem:[%s3174_s3 + $0x148] sm:$0xff]  }
  0x16   :  { %2199 = vmatprep.subr.bf16.mxu1 %v2437_v21  ;;  %v2467_v63 = vld [vmem:[%s3174_s3 + $0x198] sm:$0xff]   ;;  %v2471_v3 = vld [vmem:[%s3174_s3 + $0x190] sm:$0xff]   ;;  %v2473_v5 = vld [vmem:[%s3174_s3 + $0x1c8] sm:$0xff]  }
  0x17   :  { %v2474_v6 = vld [vmem:[%s3174_s3 + $0x108] sm:$0xff]   ;;  %v2476_v8 = vld [vmem:[%s3174_s3 + $0x140] sm:$0xff]   ;;  %v28_v14 = vld [vmem:[%s3175_s0 + $0x38] sm:$0xff] }
  0x18   :  { %2178 = vmatpush3.bf16.msra.mxu0 %v2438_v22  ;;  %v2475_v7 = vld [vmem:[%s3174_s3 + $0x188] sm:$0xff]   ;;  %v2477_v9 = vld [vmem:[%s3174_s3 + $0x1c0] sm:$0xff]   ;;  %v44_v15 = vld [vmem:[%s3175_s0 + $0xb8] sm:$0xff] }
  0x19   :  { %2200 = vmatpush3.bf16.msra.mxu1 %v2439_v23  ;;  %2179 = vmatprep.subr.bf16.mxu0 %v2440_v24  ;;  %v2478_v10 = vld [vmem:[%s3174_s3 + $0x100] sm:$0xff]   ;;  %v26_v12 = vld [vmem:[%s3175_s0 + $0x28] sm:$0xff]  ;;  %v60_v17 = vpack.c.bf16 %v44_v15, %v28_v14  ;;  %v27_v20 = vld [vmem:[%s3175_s0 + $0x30] sm:$0xff] }
  0x1a   :  { %2201 = vmatprep.subr.bf16.mxu1 %v2441_v25  ;;  %v2479_v11 = vld [vmem:[%s3174_s3 + $0x180] sm:$0xff]   ;;  %v42_v13 = vld [vmem:[%s3175_s0 + $0xa8] sm:$0xff]  ;;  %v43_v22 = vld [vmem:[%s3175_s0 + $0xb0] sm:$0xff] }
  0x1b   :  { %v58_v16 = vpack.c.bf16 %v42_v13, %v26_v12  ;;  %v25_v18 = vld [vmem:[%s3175_s0 + $0x20] sm:$0xff]  ;;  %v59_v23 = vpack.c.bf16 %v43_v22, %v27_v20  ;;  %v2480_v24 = vld [vmem:[%s3174_s3 + $0x278] sm:$0xff]   ;;  %v2488_v32 = vld [vmem:[%s3174_s3 + $0x268] sm:$0xff]  }
  0x1c   :  { %2180 = vmatpush3.bf16.msra.mxu0 %v2442_v26  ;;  %v41_v19 = vld [vmem:[%s3175_s0 + $0xa0] sm:$0xff]  ;;  %v2481_v25 = vld [vmem:[%s3174_s3 + $0x2f8] sm:$0xff]   ;;  %v2489_v33 = vld [vmem:[%s3174_s3 + $0x2e8] sm:$0xff]  }
  0x1d   :  { %2202 = vmatpush3.bf16.msra.mxu1 %v2443_v27  ;;  %2181 = vmatprep.subr.bf16.mxu0 %v2444_v28  ;;  %v57_v21 = vpack.c.bf16 %v41_v19, %v25_v18  ;;  %v2482_v26 = vld [vmem:[%s3174_s3 + $0x238] sm:$0xff]   ;;  %v2484_v28 = vld [vmem:[%s3174_s3 + $0x270] sm:$0xff]   ;;  %v2490_v34 = vld [vmem:[%s3174_s3 + $0x228] sm:$0xff]  }
  0x1e   :  { %2203 = vmatprep.subr.bf16.mxu1 %v2445_v29  ;;  %v2483_v27 = vld [vmem:[%s3174_s3 + $0x2b8] sm:$0xff]   ;;  %v2485_v29 = vld [vmem:[%s3174_s3 + $0x2f0] sm:$0xff]   ;;  %v2491_v35 = vld [vmem:[%s3174_s3 + $0x2a8] sm:$0xff]  }
  0x1f   :  { %v2492_v36 = vld [vmem:[%s3174_s3 + $0x260] sm:$0xff]   ;;  %v2497_v41 = vld [vmem:[%s3174_s3 + $0x2d8] sm:$0xff]   ;;  %v2520_v12 = vld [vmem:[%s3174_s3 + $0x368] sm:$0xff]  }
  0x20   :  { %2182 = vmatpush3.bf16.msra.mxu0 %v2446_v30  ;;  %v2486_v30 = vld [vmem:[%s3174_s3 + $0x230] sm:$0xff]   ;;  %v2493_v37 = vld [vmem:[%s3174_s3 + $0x2e0] sm:$0xff]   ;;  %v2498_v42 = vld [vmem:[%s3174_s3 + $0x218] sm:$0xff]  }
  0x21   :  { %2204 = vmatpush3.bf16.msra.mxu1 %v2447_v31  ;;  %2211 = vmatprep.subr.bf16.mxu0 %v2448_v44  ;;  %v2487_v31 = vld [vmem:[%s3174_s3 + $0x2b0] sm:$0xff]   ;;  %v2494_v38 = vld [vmem:[%s3174_s3 + $0x220] sm:$0xff]   ;;  %v2521_v13 = vld [vmem:[%s3174_s3 + $0x3e8] sm:$0xff]  }
  0x22   :  { %2233 = vmatprep.subr.bf16.mxu1 %v2449_v45  ;;  %v2495_v39 = vld [vmem:[%s3174_s3 + $0x2a0] sm:$0xff]   ;;  %v2500_v44 = vld [vmem:[%s3174_s3 + $0x250] sm:$0xff]   ;;  %v2522_v14 = vld [vmem:[%s3174_s3 + $0x328] sm:$0xff]  }
  0x23   :  { %1157 = vmatmul.mubr.bf16.vlgmr.msra.gmra.mxu0 %v53_v40  ;;  %v2496_v40 = vld [vmem:[%s3174_s3 + $0x258] sm:$0xff]   ;;  %v2501_v45 = vld [vmem:[%s3174_s3 + $0x2d0] sm:$0xff]   ;;  %v2523_v15 = vld [vmem:[%s3174_s3 + $0x3a8] sm:$0xff]  }
  0x24   :  { %1198 = vmatmul.mubr.bf16.vlgmr.msra.gmra.mxu1 %v55_v43  ;;  %2212 = vmatpush3.bf16.msra.mxu0 %v2450_v46  ;;  %v2499_v43 = vld [vmem:[%s3174_s3 + $0x298] sm:$0xff]   ;;  %v2502_v46 = vld [vmem:[%s3174_s3 + $0x210] sm:$0xff]   ;;  %v2526_v18 = vld [vmem:[%s3174_s3 + $0x320] sm:$0xff]  }
  0x25   :  { %2234 = vmatpush3.bf16.msra.mxu1 %v2451_v47  ;;  %2213 = vmatprep.subr.bf16.mxu0 %v2452_v48  ;;  %v2503_v47 = vld [vmem:[%s3174_s3 + $0x290] sm:$0xff]   ;;  %v2504_v48 = vld [vmem:[%s3174_s3 + $0x248] sm:$0xff]   ;;  %v2527_v19 = vld [vmem:[%s3174_s3 + $0x3a0] sm:$0xff]  }
  0x26   :  { %2235 = vmatprep.subr.bf16.mxu1 %v2453_v49  ;;  %1238 = vmatprep.mubr.bf16.mxu0 %v58_v16  ;;  %v2505_v49 = vld [vmem:[%s3174_s3 + $0x2c8] sm:$0xff]   ;;  %v2524_v16 = vld [vmem:[%s3174_s3 + $0x360] sm:$0xff]   ;;  %v2528_v20 = vld [vmem:[%s3174_s3 + $0x358] sm:$0xff]  }
  0x27   :  { %1279 = vmatprep.mubr.bf16.mxu1 %v60_v17  ;;  %v2525_v17 = vld [vmem:[%s3174_s3 + $0x3e0] sm:$0xff]   ;;  %v2530_v22 = vld [vmem:[%s3174_s3 + $0x318] sm:$0xff]  }
  0x28   :  { %2214 = vmatpush3.bf16.msra.mxu0 %v2454_v50  ;;  %v2506_v50 = vld [vmem:[%s3174_s3 + $0x208] sm:$0xff]  }
  0x29   :  { %2236 = vmatpush3.bf16.msra.mxu1 %v2455_v51  ;;  %2215 = vmatprep.subr.bf16.mxu0 %v2456_v52  ;;  %v2507_v51 = vld [vmem:[%s3174_s3 + $0x288] sm:$0xff]   ;;  %v2508_v52 = vld [vmem:[%s3174_s3 + $0x240] sm:$0xff]  }
  0x2a   :  { %2237 = vmatprep.subr.bf16.mxu1 %v2457_v53  ;;  %v2509_v53 = vld [vmem:[%s3174_s3 + $0x2c0] sm:$0xff]  }
  0x2c   :  { %2216 = vmatpush3.bf16.msra.mxu0 %v2458_v54  ;;  %v2510_v54 = vld [vmem:[%s3174_s3 + $0x200] sm:$0xff]  }
  0x2d   :  { %2238 = vmatpush3.bf16.msra.mxu1 %v2459_v55  ;;  %2217 = vmatprep.subr.bf16.mxu0 %v2460_v56  ;;  %v2511_v55 = vld [vmem:[%s3174_s3 + $0x280] sm:$0xff]   ;;  %v30_v56 = vld [vmem:[%s3175_s0 + $0x48] sm:$0xff] }
  0x2e   :  { %2239 = vmatprep.subr.bf16.mxu1 %v2461_v57  ;;  %v46_v57 = vld [vmem:[%s3175_s0 + $0xc8] sm:$0xff] }
  0x30   :  { %2218 = vmatpush3.bf16.msra.mxu0 %v2462_v58  ;;  %v62_v58 = vpack.c.bf16 %v46_v57, %v30_v56 }
  0x31   :  { %2240 = vmatpush3.bf16.msra.mxu1 %v2463_v59  ;;  %2219 = vmatprep.subr.bf16.mxu0 %v2464_v60  ;;  %v32_v59 = vld [vmem:[%s3175_s0 + $0x58] sm:$0xff] }
  0x32   :  { %2241 = vmatprep.subr.bf16.mxu1 %v2465_v61  ;;  %v48_v60 = vld [vmem:[%s3175_s0 + $0xd8] sm:$0xff]  ;;  %v29_v61 = vld [vmem:[%s3175_s0 + $0x40] sm:$0xff] }
  0x34   :  { %2220 = vmatpush3.bf16.msra.mxu0 %v2466_v62  ;;  %v64_v62 = vpack.c.bf16 %v48_v60, %v32_v59 }
  0x35   :  { %2242 = vmatpush3.bf16.msra.mxu1 %v2467_v63  ;;  %2221 = vmatprep.subr.bf16.mxu0 %v2468_v0  ;;  %v45_v63 = vld [vmem:[%s3175_s0 + $0xc0] sm:$0xff]  ;;  %v31_v0 = vld [vmem:[%s3175_s0 + $0x50] sm:$0xff] }
  0x36   :  { %2243 = vmatprep.subr.bf16.mxu1 %v2469_v1  ;;  %v47_v1 = vld [vmem:[%s3175_s0 + $0xd0] sm:$0xff] }
  0x38   :  { %2222 = vmatpush3.bf16.msra.mxu0 %v2470_v2  ;;  %v61_v2 = vpack.c.bf16 %v45_v63, %v29_v61 }
  0x39   :  { %2244 = vmatpush3.bf16.msra.mxu1 %v2471_v3  ;;  %2223 = vmatprep.subr.bf16.mxu0 %v2472_v4  ;;  %v63_v3 = vpack.c.bf16 %v47_v1, %v31_v0  ;;  %v2512_v4 = vld [vmem:[%s3174_s3 + $0x378] sm:$0xff]  }
  0x3a   :  { %2245 = vmatprep.subr.bf16.mxu1 %v2473_v5  ;;  %v2513_v5 = vld [vmem:[%s3174_s3 + $0x3f8] sm:$0xff]  }
  0x3c   :  { %2224 = vmatpush3.bf16.msra.mxu0 %v2474_v6  ;;  %v2514_v6 = vld [vmem:[%s3174_s3 + $0x338] sm:$0xff]  }
  0x3d   :  { %2246 = vmatpush3.bf16.msra.mxu1 %v2475_v7  ;;  %2225 = vmatprep.subr.bf16.mxu0 %v2476_v8  ;;  %v2515_v7 = vld [vmem:[%s3174_s3 + $0x3b8] sm:$0xff]   ;;  %v2516_v8 = vld [vmem:[%s3174_s3 + $0x370] sm:$0xff]  }
  0x3e   :  { %2247 = vmatprep.subr.bf16.mxu1 %v2477_v9  ;;  %v2517_v9 = vld [vmem:[%s3174_s3 + $0x3f0] sm:$0xff]  }
  0x40   :  { %2226 = vmatpush3.bf16.msra.mxu0 %v2478_v10  ;;  %v2518_v10 = vld [vmem:[%s3174_s3 + $0x330] sm:$0xff]  }
  0x41   :  { %2248 = vmatpush3.bf16.msra.mxu1 %v2479_v11  ;;  %2255 = vmatprep.subr.bf16.mxu0 %v2480_v24  ;;  %v2519_v11 = vld [vmem:[%s3174_s3 + $0x3b0] sm:$0xff]  }
  0x42   :  { %2277 = vmatprep.subr.bf16.mxu1 %v2481_v25  ;;  %v2532_v24 = vld [vmem:[%s3174_s3 + $0x350] sm:$0xff]  }
  0x43   :  { %1239 = vmatmul.mubr.bf16.vlgmr.msra.gmra.mxu0 %v57_v21  ;;  %v2529_v21 = vld [vmem:[%s3174_s3 + $0x3d8] sm:$0xff]   ;;  %v2533_v25 = vld [vmem:[%s3174_s3 + $0x3d0] sm:$0xff]  }
  0x44   :  { %1280 = vmatmul.mubr.bf16.vlgmr.msra.gmra.mxu1 %v59_v23  ;;  %2256 = vmatpush3.bf16.msra.mxu0 %v2482_v26  ;;  %v2531_v23 = vld [vmem:[%s3174_s3 + $0x398] sm:$0xff]   ;;  %v2534_v26 = vld [vmem:[%s3174_s3 + $0x310] sm:$0xff]  }
  0x45   :  { %2278 = vmatpush3.bf16.msra.mxu1 %v2483_v27  ;;  %2257 = vmatprep.subr.bf16.mxu0 %v2484_v28  ;;  %v2535_v27 = vld [vmem:[%s3174_s3 + $0x390] sm:$0xff]   ;;  %v2536_v28 = vld [vmem:[%s3174_s3 + $0x348] sm:$0xff]  }
  0x46   :  { %2279 = vmatprep.subr.bf16.mxu1 %v2485_v29  ;;  %1320 = vmatprep.mubr.bf16.mxu0 %v62_v58  ;;  %v2537_v29 = vld [vmem:[%s3174_s3 + $0x3c8] sm:$0xff]  }
  0x47   :  { %1361 = vmatprep.mubr.bf16.mxu1 %v64_v62 }
  0x48   :  { %2258 = vmatpush3.bf16.msra.mxu0 %v2486_v30  ;;  %v2538_v30 = vld [vmem:[%s3174_s3 + $0x308] sm:$0xff]  }
  0x49   :  { %2280 = vmatpush3.bf16.msra.mxu1 %v2487_v31  ;;  %2259 = vmatprep.subr.bf16.mxu0 %v2488_v32  ;;  %v2539_v31 = vld [vmem:[%s3174_s3 + $0x388] sm:$0xff]   ;;  %v2540_v32 = vld [vmem:[%s3174_s3 + $0x340] sm:$0xff]  }
  0x4a   :  { %2281 = vmatprep.subr.bf16.mxu1 %v2489_v33  ;;  %v2541_v33 = vld [vmem:[%s3174_s3 + $0x3c0] sm:$0xff]  }
  0x4c   :  { %2260 = vmatpush3.bf16.msra.mxu0 %v2490_v34  ;;  %v2542_v34 = vld [vmem:[%s3174_s3 + $0x300] sm:$0xff]  }
  0x4d   :  { %2282 = vmatpush3.bf16.msra.mxu1 %v2491_v35  ;;  %2261 = vmatprep.subr.bf16.mxu0 %v2492_v36  ;;  %v2543_v35 = vld [vmem:[%s3174_s3 + $0x380] sm:$0xff]   ;;  %v34_v36 = vld [vmem:[%s3175_s0 + $0x68] sm:$0xff] }
  0x4e   :  { %2283 = vmatprep.subr.bf16.mxu1 %v2493_v37  ;;  %v50_v37 = vld [vmem:[%s3175_s0 + $0xe8] sm:$0xff] }
  0x50   :  { %2262 = vmatpush3.bf16.msra.mxu0 %v2494_v38  ;;  %v36_v38 = vld [vmem:[%s3175_s0 + $0x78] sm:$0xff] }
  0x51   :  { %2284 = vmatpush3.bf16.msra.mxu1 %v2495_v39  ;;  %2263 = vmatprep.subr.bf16.mxu0 %v2496_v40  ;;  %v66_v39 = vpack.c.bf16 %v50_v37, %v34_v36  ;;  %v52_v40 = vld [vmem:[%s3175_s0 + $0xf8] sm:$0xff] }
  0x52   :  { %2285 = vmatprep.subr.bf16.mxu1 %v2497_v41  ;;  %v33_v41 = vld [vmem:[%s3175_s0 + $0x60] sm:$0xff] }
  0x54   :  { %2264 = vmatpush3.bf16.msra.mxu0 %v2498_v42  ;;  %v49_v42 = vld [vmem:[%s3175_s0 + $0xe0] sm:$0xff] }
  0x55   :  { %2286 = vmatpush3.bf16.msra.mxu1 %v2499_v43  ;;  %2265 = vmatprep.subr.bf16.mxu0 %v2500_v44  ;;  %v68_v43 = vpack.c.bf16 %v52_v40, %v36_v38  ;;  %v65_v44 = vpack.c.bf16 %v49_v42, %v33_v41 }
  0x56   :  { %2287 = vmatprep.subr.bf16.mxu1 %v2501_v45  ;;  %v35_v45 = vld [vmem:[%s3175_s0 + $0x70] sm:$0xff] }
  0x58   :  { %2266 = vmatpush3.bf16.msra.mxu0 %v2502_v46  ;;  %v51_v46 = vld [vmem:[%s3175_s0 + $0xf0] sm:$0xff] }
  0x59   :  { %2288 = vmatpush3.bf16.msra.mxu1 %v2503_v47  ;;  %2267 = vmatprep.subr.bf16.mxu0 %v2504_v48  ;;  %v88_v47 = vld [vmem:[%s3176_s1 + $0x8] sm:$0xff]  ;;  %v67_v48 = vpack.c.bf16 %v51_v46, %v35_v45 }
  0x5a   :  { %2289 = vmatprep.subr.bf16.mxu1 %v2505_v49  ;;  %92 = vrot.lane.b32.xlu0 %v88_v47, %s2564_s14  ;;  %v87_v49 = vld [vmem:[%s3176_s1] sm:$0xff] }
  0x5c   :  { %2268 = vmatpush3.bf16.msra.mxu0 %v2506_v50  ;;  %v3084_v50 = vsel %vm89_vm0, %v87_v49, 0.0 }
  0x5d   :  { %2290 = vmatpush3.bf16.msra.mxu1 %v2507_v51  ;;  %2269 = vmatprep.subr.bf16.mxu0 %v2508_v52 }
  0x5e   :  { %2291 = vmatprep.subr.bf16.mxu1 %v2509_v53 }
  0x60   :  { %2270 = vmatpush3.bf16.msra.mxu0 %v2510_v54 }
  0x61   :  { %2292 = vmatpush3.bf16.msra.mxu1 %v2511_v55  ;;  %2299 = vmatprep.subr.bf16.mxu0 %v2512_v4 }
  0x62   :  { %2321 = vmatprep.subr.bf16.mxu1 %v2513_v5 }
  0x63   :  { %1321 = vmatmul.mubr.bf16.vlgmr.msra.gmra.mxu0 %v61_v2 }
  0x64   :  { %1362 = vmatmul.mubr.bf16.vlgmr.msra.gmra.mxu1 %v63_v3  ;;  %2300 = vmatpush3.bf16.msra.mxu0 %v2514_v6 }
  0x65   :  { %2322 = vmatpush3.bf16.msra.mxu1 %v2515_v7  ;;  %2301 = vmatprep.subr.bf16.mxu0 %v2516_v8  ;;  %v2024_v7 = vld [vmem:[%s3177_s4] ss:$0 sm:$0xff] }
  0x66   :  { %2323 = vmatprep.subr.bf16.mxu1 %v2517_v9  ;;  %1402 = vmatprep.mubr.bf16.mxu0 %v66_v39 }
  0x67   :  { %1443 = vmatprep.mubr.bf16.mxu1 %v68_v43 }
  0x68   :  { %2302 = vmatpush3.bf16.msra.mxu0 %v2518_v10 }
  0x69   :  { %2324 = vmatpush3.bf16.msra.mxu1 %v2519_v11  ;;  %2303 = vmatprep.subr.bf16.mxu0 %v2520_v12 }
  0x6a   :  { %2325 = vmatprep.subr.bf16.mxu1 %v2521_v13 }
  0x6c   :  { %2304 = vmatpush3.bf16.msra.mxu0 %v2522_v14 }
  0x6d   :  { %2326 = vmatpush3.bf16.msra.mxu1 %v2523_v15  ;;  %2305 = vmatprep.subr.bf16.mxu0 %v2524_v16 }
  0x6e   :  { %2327 = vmatprep.subr.bf16.mxu1 %v2525_v17 }
  0x70   :  { %2306 = vmatpush3.bf16.msra.mxu0 %v2526_v18 }
  0x71   :  { %2328 = vmatpush3.bf16.msra.mxu1 %v2527_v19  ;;  %2307 = vmatprep.subr.bf16.mxu0 %v2528_v20 }
  0x72   :  { %2329 = vmatprep.subr.bf16.mxu1 %v2529_v21 }
  0x74   :  { %2308 = vmatpush3.bf16.msra.mxu0 %v2530_v22 }
  0x75   :  { %2330 = vmatpush3.bf16.msra.mxu1 %v2531_v23  ;;  %2309 = vmatprep.subr.bf16.mxu0 %v2532_v24 }
  0x76   :  { %2331 = vmatprep.subr.bf16.mxu1 %v2533_v25 }
  0x78   :  { %2310 = vmatpush3.bf16.msra.mxu0 %v2534_v26 }
  0x79   :  { %2332 = vmatpush3.bf16.msra.mxu1 %v2535_v27  ;;  %2311 = vmatprep.subr.bf16.mxu0 %v2536_v28 }
  0x7a   :  { %2333 = vmatprep.subr.bf16.mxu1 %v2537_v29 }
  0x7c   :  { %2312 = vmatpush3.bf16.msra.mxu0 %v2538_v30 }
  0x7d   :  { %2334 = vmatpush3.bf16.msra.mxu1 %v2539_v31  ;;  %2313 = vmatprep.subr.bf16.mxu0 %v2540_v32 }
  0x7e   :  { %2335 = vmatprep.subr.bf16.mxu1 %v2541_v33 }
  0x80   :  { %2314 = vmatpush3.bf16.msra.mxu0 %v2542_v34 }
  0x81   :  { %2336 = vmatpush3.bf16.msra.mxu1 %v2543_v35 }
  0x83   :  { %1403 = vmatmul.mubr.bf16.vlgmr.msra.gmra.mxu0 %v65_v44 }
  0x84   :  { %1444 = vmatmul.mubr.bf16.vlgmr.msra.gmra.mxu1 %v67_v48  ;;  %2372 = vmatprep.mubr.msk.f32.mxu0 %vm1456_vm1, %v3084_v50 }
  0xe3   :  { %v2183_v51 = vpop.f32.mrf.mxu0 }
  0xe4   :  { %v2205_v52 = vpop.f32.mrf.mxu1 }
  0xe5   :  { %v2184_v53 = vpop.f32.mrf.mxu0 }
  0xe6   :  { %v2206_v54 = vpop.f32.mrf.mxu1  ;;  %v2185_v4 = vadd.f32 %v2184_v53, %v2183_v51 }
  0xe7   :  { %v2186_v55 = vpop.f32.mrf.mxu0  ;;  %v2207_v10 = vadd.f32 %v2206_v54, %v2205_v52  ;;  %v93_v52 = vpop.permute.xlu0 %92 }
  0xe8   :  { %v2208_v56 = vpop.f32.mrf.mxu1  ;;  %v1159_v9 = vadd.f32 %v2185_v4, %v2024_v7  ;;  %v3092_v54 = vsel %vm89_vm0, 0.0, %v93_v52  ;;  %v70_v52 = vld [vmem:[%s3178_s2 + $0x8] sm:$0xff] }
  0xe9   :  { %v2187_v57 = vpop.f32.mrf.mxu0 }
  0xea   :  { %v2209_v59 = vpop.f32.mrf.mxu1  ;;  %v2188_v5 = vadd.f32 %v2187_v57, %v2186_v55  ;;  %v1200_v17 = vadd.f32 %v2207_v10, %v1159_v9  ;;  %v2153_v55 = vld [vmem:[%s3177_s4 + $0x1] ss:$0 sm:$0xff]  ;;  %v81_v9 = vld [vmem:[%s3177_s4 + $0x30] sm:$0xff]  ;;  %v80_v10 = vld [vmem:[%s3177_s4 + $0x28] sm:$0xff] }
  0xeb   :  { %v2210_v14 = vadd.f32 %v2209_v59, %v2208_v56 }
  0xec   :  { %v1162_v11 = vadd.f32 %v2188_v5, %v2024_v7  ;;  %v83_v7 = vld [vmem:[%s3177_s4 + $0x40] sm:$0xff] }
  0xed   :  { %2375 = vmatprep.subr.mxu1 %v83_v7 }
  0xee   :  { %v1203_v18 = vadd.f32 %v2210_v14, %v1162_v11  ;;  %2376 = vmatpush3.msra.mxu1 %v83_v7  ;;  %v79_v11 = vld [vmem:[%s3177_s4 + $0x20] sm:$0xff]  ;;  %v76_v14 = vld [vmem:[%s3177_s4 + $0x8] sm:$0xff] }
 0x103   :  { %v2227_v58 = vpop.f32.mrf.mxu0 }
 0x104   :  { %v2249_v60 = vpop.f32.mrf.mxu1 }
 0x105   :  { %v2228_v61 = vpop.f32.mrf.mxu0 }
 0x106   :  { %v2250_v62 = vpop.f32.mrf.mxu1  ;;  %v2229_v15 = vadd.f32 %v2228_v61, %v2227_v58 }
 0x107   :  { %v2230_v63 = vpop.f32.mrf.mxu0  ;;  %v2251_v22 = vadd.f32 %v2250_v62, %v2249_v60 }
 0x108   :  { %v2252_v0 = vpop.f32.mrf.mxu1  ;;  %v1241_v21 = vadd.f32 %v2229_v15, %v1200_v17 }
 0x109   :  { %v2231_v1 = vpop.f32.mrf.mxu0 }
 0x10a   :  { %v2253_v3 = vpop.f32.mrf.mxu1  ;;  %v2232_v16 = vadd.f32 %v2231_v1, %v2230_v63  ;;  %v1282_v29 = vadd.f32 %v2251_v22, %v1241_v21 }
 0x10b   :  { %v2254_v24 = vadd.f32 %v2253_v3, %v2252_v0 }
 0x10c   :  { %v1244_v23 = vadd.f32 %v2232_v16, %v1203_v18 }
 0x10e   :  { %v1285_v30 = vadd.f32 %v2254_v24, %v1244_v23 }
 0x123   :  { %v2271_v2 = vpop.f32.mrf.mxu0 }
 0x124   :  { %v2293_v6 = vpop.f32.mrf.mxu1 }
 0x125   :  { %v2272_v8 = vpop.f32.mrf.mxu0 }
 0x126   :  { %v2294_v12 = vpop.f32.mrf.mxu1  ;;  %v2273_v25 = vadd.f32 %v2272_v8, %v2271_v2  ;;  %v82_v8 = vld [vmem:[%s3177_s4 + $0x38] sm:$0xff] }
 0x127   :  { %v2274_v13 = vpop.f32.mrf.mxu0  ;;  %v2295_v34 = vadd.f32 %v2294_v12, %v2293_v6  ;;  %2377 = vmatprep.subr.mxu1 %v82_v8  ;;  %v78_v12 = vld [vmem:[%s3177_s4 + $0x18] sm:$0xff] }
 0x128   :  { %v2296_v19 = vpop.f32.mrf.mxu1  ;;  %v1323_v33 = vadd.f32 %v2273_v25, %v1282_v29  ;;  %2378 = vmatpush3.msra.mxu1 %v82_v8 }
 0x129   :  { %v2275_v20 = vpop.f32.mrf.mxu0  ;;  %2379 = vmatprep.subr.mxu1 %v81_v9 }
 0x12a   :  { %v2276_v26 = vadd.f32 %v2275_v20, %v2274_v13  ;;  %v2297_v27 = vpop.f32.mrf.mxu1  ;;  %v1364_v42 = vadd.f32 %v2295_v34, %v1323_v33  ;;  %2380 = vmatpush3.msra.mxu1 %v81_v9  ;;  %v77_v13 = vld [vmem:[%s3177_s4 + $0x10] sm:$0xff] }
 0x12b   :  { %v2298_v38 = vadd.f32 %v2297_v27, %v2296_v19  ;;  %2381 = vmatprep.subr.mxu1 %v80_v10 }
 0x12c   :  { %v1326_v35 = vadd.f32 %v2276_v26, %v1285_v30  ;;  %2382 = vmatpush3.msra.mxu1 %v80_v10 }
 0x12d   :  { %2383 = vmatprep.subr.mxu1 %v79_v11 }
 0x12e   :  { %v1367_v43 = vadd.f32 %v2298_v38, %v1326_v35  ;;  %2384 = vmatpush3.msra.mxu1 %v79_v11 }
 0x12f   :  { %2385 = vmatprep.subr.mxu1 %v78_v12 }
 0x130   :  { %2386 = vmatpush3.msra.mxu1 %v78_v12 }
 0x131   :  { %2387 = vmatprep.subr.mxu1 %v77_v13 }
 0x132   :  { %2388 = vmatpush3.msra.mxu1 %v77_v13 }
 0x133   :  { %2389 = vmatprep.subr.mxu1 %v76_v14 }
 0x134   :  { %2390 = vmatpush3.msra.mxu1 %v76_v14 }
 0x143   :  { %v2315_v28 = vpop.f32.mrf.mxu0 }
 0x144   :  { %v2337_v31 = vpop.f32.mrf.mxu1 }
 0x145   :  { %v2316_v32 = vpop.f32.mrf.mxu0 }
 0x146   :  { %v2338_v36 = vpop.f32.mrf.mxu1  ;;  %v2317_v39 = vadd.f32 %v2316_v32, %v2315_v28  ;;  %v2158_v32 = vld [vmem:[%s3177_s4 + $0x2] ss:$0 sm:$0xff] }
 0x147   :  { %v2318_v37 = vpop.f32.mrf.mxu0  ;;  %v2339_v49 = vadd.f32 %v2338_v36, %v2337_v31 }
 0x148   :  { %v2340_v40 = vpop.f32.mrf.mxu1  ;;  %v1405_v46 = vadd.f32 %v2317_v39, %v1364_v42 }
 0x149   :  { %v2319_v41 = vpop.f32.mrf.mxu0 }
 0x14a   :  { %v2320_v44 = vadd.f32 %v2319_v41, %v2318_v37  ;;  %v2341_v45 = vpop.f32.mrf.mxu1  ;;  %v1446_v53 = vadd.f32 %v2339_v49, %v1405_v46  ;;  %v85_v49 = vld [vmem:[%s3177_s4 + $0x50] sm:$0xff] }
 0x14b   :  { %v2342_v48 = vadd.f32 %v2341_v45, %v2340_v40 }
 0x14c   :  { %v1408_v47 = vadd.f32 %v2320_v44, %v1367_v43 }
 0x14e   :  { %v1449_v51 = vadd.f32 %v2342_v48, %v1408_v47  ;;  %v86_v48 = vld [vmem:[%s3177_s4 + $0x58] sm:$0xff] }
 0x150   :  { %2368 = vmatprep.subr.mxu0 %v1449_v51 }
 0x151   :  { %2369 = vmatpush3.msra.mxu0 %v1449_v51  ;;  %v69_v51 = vld [vmem:[%s3178_s2] sm:$0xff] }
 0x152   :  { %2370 = vmatprep.subr.mxu0 %v1446_v53 }
 0x153   :  { %2371 = vmatpush3.msra.mxu0 %v1446_v53  ;;  %v84_v53 = vld [vmem:[%s3177_s4 + $0x48] sm:$0xff] }
 0x154   :  { %2373 = vmatmul.mubr.msk.f32.vlgmr.msra.gmra.mxu0 %vm1456_vm1, %v3092_v54 }
 0x155   :  { %2398 = vmatprep.mubr.msk.f32.mxu0 %vm1456_vm1, %v3084_v50 }
 0x214   :  { %v2374_v56 = vpop.f32.mrf.mxu0 }
 0x215   :  { %v1535_v57 = vadd.f32 %v2374_v56, %v2153_v55 }
 0x216   :  { %v1529_v58 = vpop.f32.mrf.mxu0 }
 0x217   :  { %v1530_v59 = vadd.f32 %v2153_v55, %v1529_v58  ;;  %v1542_v60 = vsel %vm1538_vm2, %v1535_v57, 0.0 }
 0x218   :  { %1543 = vadd.xlane.f32.xlu1 %v1542_v60 }
 0x219   :  { %v1539_v61 = vsel %vm1538_vm2, %v1530_v59, 0.0 }
 0x21a   :  { %1540 = vadd.xlane.f32.xlu0 %v1539_v61 }
 0x2a1   :  { %v1544_v62 = vpop.xlane.xlu1 %1543 }
 0x2a2   :  { %v1547_v63 = vmul.f32 0.015625, %v1544_v62 }
 0x2a3   :  { %v1541_v0 = vpop.xlane.xlu0 %1540 }
 0x2a4   :  { %v1546_v1 = vmul.f32 0.015625, %v1541_v0  ;;  %v1549_v50 = vsub.f32 %v1535_v57, %v1547_v63 }
 0x2a6   :  { %v1548_v2 = vsub.f32 %v1530_v59, %v1546_v1  ;;  %v1551_v5 = vmul.f32 %v1549_v50, %v1549_v50 }
 0x2a8   :  { %v1550_v3 = vmul.f32 %v1548_v2, %v1548_v2  ;;  %v1555_v6 = vsel %vm1538_vm2, %v1551_v5, 0.0 }
 0x2aa   :  { %v1552_v4 = vsel %vm1538_vm2, %v1550_v3, 0.0  ;;  %v2166_v3 = vld [vmem:[%s3177_s4 + $0x4] ss:$0 sm:$0xff] }
 0x2ab   :  { %1553 = vadd.xlane.f32.xlu1 %v1552_v4  ;;  %2003 = vrot.lane.b32.xlu0 %v2166_v3, %s2565_s20 }
 0x2af   :  { %1556 = vadd.xlane.f32.xlu1 %v1555_v6  ;;  %v2165_v6 = vld [vmem:[%s3177_s4 + $0x3] ss:$0 sm:$0xff]  ;;  %s2566_s4 = smov 124  }
 0x334   :  { %v1554_v15 = vpop.xlane.xlu1 %1553 }
 0x335   :  { %v1558_v16 = vmul.f32 0.015625, %v1554_v15 }
 0x337   :  { %v1560_v17 = vadd.f32 1e-05, %v1558_v16 }
 0x338   :  { %v1557_v18 = vpop.xlane.xlu1 %1556 }
 0x339   :  { %2544 = vrsqrt.f32 %v1560_v17  ;;  %v1559_v19 = vmul.f32 0.015625, %v1557_v18 }
 0x33b   :  { %v1561_v20 = vadd.f32 1e-05, %v1559_v19 }
 0x33d   :  { %2546 = vrsqrt.f32 %v1561_v20 }
 0x346   :  { %v2545_v21 = vpop.eup %2544 }
 0x347   :  { %v1564_v22 = vmul.f32 %v2545_v21, %v1548_v2 }
 0x349   :  { %vm1566_vm3 = vcmp.gt.f32.partialorder %v1564_v22, 0.0  ;;  %v1568_v23 = vmul.f32 0.2, %v1564_v22 }
 0x34a   :  { %v2547_v24 = vpop.eup %2546 }
 0x34b   :  { %v1570_v25 = vsel %vm1566_vm3, %v1564_v22, %v1568_v23  ;;  %v1565_v26 = vmul.f32 %v2547_v24, %v1549_v50 }
 0x34c   :  { %2391 = vmatprep.mubr.msk.f32.mxu1 %vm1538_vm2, %v1570_v25 }
 0x34d   :  { %vm1567_vm4 = vcmp.gt.f32.partialorder %v1565_v26, 0.0  ;;  %v1569_v27 = vmul.f32 0.2, %v1565_v26 }
 0x34f   :  { %v1571_v28 = vsel %vm1567_vm4, %v1565_v26, %v1569_v27 }
 0x350   :  { %2392 = vmatmul.mubr.msk.f32.vlgmr.msra.gmra.mxu1 %vm1538_vm2, %v1571_v28 }
 0x410   :  { %v2393_v29 = vpop.f32.mrf.mxu1 }
 0x411   :  { %2394 = vmatprep.subr.mxu0 %v2393_v29 }
 0x412   :  { %v1644_v30 = vpop.f32.mrf.mxu1  ;;  %2395 = vmatpush3.msra.mxu0 %v2393_v29 }
 0x413   :  { %2396 = vmatprep.subr.mxu0 %v1644_v30 }
 0x414   :  { %2397 = vmatpush3.msra.mxu0 %v1644_v30 }
 0x415   :  { %2399 = vmatmul.mubr.msk.f32.vlgmr.msra.gmra.mxu0 %vm1456_vm1, %v3092_v54  ;;  %2401 = vmatprep.subr.mxu0 %v86_v48 }
 0x416   :  { %2402 = vmatpush3.msra.mxu0 %v86_v48  ;;  %2403 = vmatprep.mubr.msk.f32.mxu0 %vm89_vm0, %v69_v51 }
 0x417   :  { %2406 = vmatprep.subr.mxu0 %v85_v49 }
 0x419   :  { %2404 = vmatmul.mubr.msk.f32.vlgmr.msra.gmra.mxu0 %vm89_vm0, %v70_v52 }
 0x41a   :  { %2407 = vmatpush3.msra.mxu0 %v85_v49 }
 0x41b   :  { %2408 = vmatprep.subr.mxu0 %v84_v53 }
 0x41c   :  { %2409 = vmatpush3.msra.mxu0 %v84_v53 }
 0x4d5   :  { %v2400_v31 = vpop.f32.mrf.mxu0 }
 0x4d6   :  { %v1729_v35 = vadd.f32 %v2400_v31, %v2158_v32 }
 0x4d7   :  { %v1723_v33 = vpop.f32.mrf.mxu0 }
 0x4d8   :  { %v1724_v34 = vadd.f32 %v2158_v32, %v1723_v33  ;;  %v1735_v37 = vsel %vm1456_vm1, %v1729_v35, 0.0 }
 0x4d9   :  { %v2405_v4 = vpop.f32.mrf.mxu0 }
 0x4da   :  { %v1732_v36 = vsel %vm1456_vm1, %v1724_v34, 0.0 }
 0x4db   :  { %1733 = vadd.xlane.f32.xlu1 %v1732_v36  ;;  %v1837_v5 = vpop.f32.mrf.mxu0 }
 0x4df   :  { %1736 = vadd.xlane.f32.xlu1 %v1735_v37 }
 0x564   :  { %v1734_v38 = vpop.xlane.xlu1 %1733 }
 0x565   :  { %v1739_v39 = vmul.f32 0.0625, %v1734_v38 }
 0x567   :  { %v1741_v40 = vsub.f32 %v1724_v34, %v1739_v39 }
 0x568   :  { %v1737_v41 = vpop.xlane.xlu1 %1736 }
 0x569   :  { %v1740_v42 = vmul.f32 0.0625, %v1737_v41  ;;  %v1743_v43 = vmul.f32 %v1741_v40, %v1741_v40 }
 0x56b   :  { %v1742_v44 = vsub.f32 %v1729_v35, %v1740_v42  ;;  %v1745_v45 = vsel %vm1456_vm1, %v1743_v43, 0.0 }
 0x56c   :  { %1746 = vadd.xlane.f32.xlu1 %v1745_v45 }
 0x56d   :  { %v1744_v46 = vmul.f32 %v1742_v44, %v1742_v44 }
 0x56f   :  { %v1748_v47 = vsel %vm1456_vm1, %v1744_v46, 0.0 }
 0x570   :  { %1749 = vadd.xlane.f32.xlu1 %v1748_v47 }
 0x5f5   :  { %v1747_v54 = vpop.xlane.xlu1 %1746 }
 0x5f6   :  { %v1751_v55 = vmul.f32 0.0625, %v1747_v54 }
 0x5f8   :  { %v1753_v56 = vadd.f32 1e-05, %v1751_v55 }
 0x5f9   :  { %v1750_v57 = vpop.xlane.xlu1 %1749 }
 0x5fa   :  { %2548 = vrsqrt.f32 %v1753_v56  ;;  %v1752_v58 = vmul.f32 0.0625, %v1750_v57 }
 0x5fc   :  { %v1754_v59 = vadd.f32 1e-05, %v1752_v58 }
 0x5fe   :  { %2550 = vrsqrt.f32 %v1754_v59 }
 0x607   :  { %v2549_v60 = vpop.eup %2548 }
 0x608   :  { %v1757_v61 = vmul.f32 %v2549_v60, %v1741_v40 }
 0x60a   :  { %vm1759_vm5 = vcmp.gt.f32.partialorder %v1757_v61, 0.0  ;;  %v1761_v62 = vmul.f32 0.2, %v1757_v61 }
 0x60b   :  { %v2551_v63 = vpop.eup %2550 }
 0x60c   :  { %v1763_v0 = vsel %vm1759_vm5, %v1757_v61, %v1761_v62  ;;  %v1758_v1 = vmul.f32 %v2551_v63, %v1742_v44 }
 0x60d   :  { %2410 = vmatprep.mubr.msk.f32.mxu0 %vm1456_vm1, %v1763_v0 }
 0x60e   :  { %vm1760_vm6 = vcmp.gt.f32.partialorder %v1758_v1, 0.0  ;;  %v1762_v50 = vmul.f32 0.2, %v1758_v1 }
 0x610   :  { %v1764_v2 = vsel %vm1760_vm6, %v1758_v1, %v1762_v50 }
 0x611   :  { %2411 = vmatmul.mubr.msk.f32.vlgmr.msra.gmra.mxu0 %vm1456_vm1, %v1764_v2 }
 0x6d1   :  { %v2412_v7 = vpop.f32.mrf.mxu0 }
 0x6d2   :  { %v1924_v8 = vadd.f32 %v2412_v7, %v2405_v4 }
 0x6d3   :  { %v1918_v9 = vpop.f32.mrf.mxu0 }
 0x6d4   :  { %v1932_v10 = vadd.f32 %v2165_v6, %v1924_v8  ;;  %v1919_v11 = vadd.f32 %v1918_v9, %v1837_v5  ;;  %v2004_v5 = vpop.permute.xlu0 %2003 }
 0x6d6   :  { %v1941_v12 = vsel %vm1933_vm7, %v1932_v10, -inf  ;;  %v1931_v13 = vadd.f32 %v2165_v6, %v1919_v11 }
 0x6d7   :  { %v1942_v14 = vrot.slane %v1941_v12, 4 }
 0x6d8   :  { %v1934_v15 = vsel %vm1933_vm7, %v1931_v13, -inf }
 0x6d9   :  { %v1943_v16 = vmax.f32 %v1941_v12, %v1942_v14  ;;  %v1935_v17 = vrot.slane %v1934_v15, 4 }
 0x6db   :  { %v1944_v18 = vrot.slane %v1943_v16, 2  ;;  %v1936_v19 = vmax.f32 %v1934_v15, %v1935_v17 }
 0x6dd   :  { %v1945_v20 = vmax.f32 %v1943_v16, %v1944_v18  ;;  %v1937_v21 = vrot.slane %v1936_v19, 2 }
 0x6df   :  { %v1946_v22 = vrot.slane %v1945_v20, 1  ;;  %v1938_v23 = vmax.f32 %v1936_v19, %v1937_v21 }
 0x6e1   :  { %v1947_v24 = vmax.f32 %v1945_v20, %v1946_v22  ;;  %v1939_v25 = vrot.slane %v1938_v23, 1 }
 0x6e3   :  { %v1949_v26 = vsub.f32 %v1932_v10, %v1947_v24  ;;  %v1940_v27 = vmax.f32 %v1938_v23, %v1939_v25 }
 0x6e5   :  { %v1952_v28 = vmul.f32 1.442695, %v1949_v26  ;;  %v1948_v29 = vsub.f32 %v1931_v13, %v1940_v27 }
 0x6e7   :  { %2552 = vpow2.f32 %v1952_v28  ;;  %v1950_v30 = vmul.f32 1.442695, %v1948_v29 }
 0x6e9   :  { %2554 = vpow2.f32 %v1950_v30 }
 0x6f4   :  { %v2553_v31 = vpop.eup %2552 }
 0x6f5   :  { %v1961_v32 = vsel %vm1933_vm7, %v2553_v31, 0.0 }
 0x6f6   :  { %v2555_v33 = vpop.eup %2554  ;;  %v1962_v34 = vrot.slane %v1961_v32, 4 }
 0x6f7   :  { %v1954_v35 = vsel %vm1933_vm7, %v2555_v33, 0.0 }
 0x6f8   :  { %v1963_v36 = vadd.f32 %v1962_v34, %v1961_v32  ;;  %v1955_v37 = vrot.slane %v1954_v35, 4 }
 0x6fa   :  { %v1964_v38 = vrot.slane %v1963_v36, 2  ;;  %v1956_v39 = vadd.f32 %v1955_v37, %v1954_v35 }
 0x6fc   :  { %v1965_v40 = vadd.f32 %v1964_v38, %v1963_v36  ;;  %v1957_v41 = vrot.slane %v1956_v39, 2 }
 0x6fe   :  { %v1966_v42 = vrot.slane %v1965_v40, 1  ;;  %v1958_v43 = vadd.f32 %v1957_v41, %v1956_v39 }
 0x700   :  { %v1967_v44 = vadd.f32 %v1966_v42, %v1965_v40  ;;  %v1959_v45 = vrot.slane %v1958_v43, 1 }
 0x702   :  { %2556 = vrcp.f32 %v1967_v44  ;;  %v1960_v46 = vadd.f32 %v1959_v45, %v1958_v43 }
 0x704   :  { %2558 = vrcp.f32 %v1960_v46 }
 0x70f   :  { %v2557_v47 = vpop.eup %2556 }
 0x710   :  { %v1971_v48 = vmul.f32 %v2557_v47, %v2553_v31 }
 0x711   :  { %v2559_v49 = vpop.eup %2558 }
 0x712   :  { %v1975_v51 = vsel %vm1933_vm7, %v1971_v48, 0.0  ;;  %v1969_v52 = vmul.f32 %v2559_v49, %v2555_v33 }
 0x713   :  { %1976 = vadd.xlane.f32.xlu1 %v1975_v51 }
 0x714   :  { %v1972_v53 = vsel %vm1933_vm7, %v1969_v52, 0.0 }
 0x717   :  { %1973 = vadd.xlane.f32.xlu1 %v1972_v53 }
 0x79c   :  { %v1977_v54 = vpop.xlane.xlu1 %1976 }
 0x79d   :  { %v1980_v55 = vmul.f32 0.25, %v1977_v54 }
 0x79f   :  { %v1982_v56 = vmul.f32 %v1980_v55, %v1932_v10 }
 0x7a0   :  { %v1974_v57 = vpop.xlane.xlu1 %1973 }
 0x7a1   :  { %v1991_v58 = vsel %vm1983_vm8, %v1982_v56, 0.0  ;;  %v1979_v59 = vmul.f32 0.25, %v1974_v57 }
 0x7a2   :  { %v1992_v60 = vrot.slane %v1991_v58, 4 }
 0x7a3   :  { %v1981_v61 = vmul.f32 %v1979_v59, %v1931_v13 }
 0x7a4   :  { %v1993_v62 = vadd.f32 %v1992_v60, %v1991_v58 }
 0x7a5   :  { %v1984_v63 = vsel %vm1983_vm8, %v1981_v61, 0.0 }
 0x7a6   :  { %v1985_v0 = vrot.slane %v1984_v63, 4  ;;  %v1994_v1 = vrot.slane %v1993_v62, 2 }
 0x7a8   :  { %v1986_v50 = vadd.f32 %v1985_v0, %v1984_v63  ;;  %v1995_v2 = vadd.f32 %v1994_v1, %v1993_v62 }
 0x7aa   :  { %v1987_v3 = vrot.slane %v1986_v50, 2  ;;  %v1996_v4 = vrot.slane %v1995_v2, 1 }
 0x7ac   :  { %v1988_v6 = vadd.f32 %v1987_v3, %v1986_v50  ;;  %v1997_v7 = vadd.f32 %v1996_v4, %v1995_v2 }
 0x7ae   :  { %v1989_v8 = vrot.slane %v1988_v6, 1  ;;  %v2007_v9 = vadd.f32 %v2004_v5, %v1997_v7 }
 0x7b0   :  { %v1990_v11 = vadd.f32 %v1989_v8, %v1988_v6  ;;  %2560 = vtanh.f32 %v2007_v9 }
 0x7b2   :  { %v2006_v10 = vadd.f32 %v2004_v5, %v1990_v11 }
 0x7b4   :  { %2562 = vtanh.f32 %v2006_v10 }
 0x7bd   :  { %v2561_v12 = vpop.eup %2560 }
 0x7be   :  { %v2012_v13 = vrot.slane %v2561_v12, 7 }
 0x7c1   :  { %v2563_v14 = vpop.eup %2562 }
 0x7c2   :  { %v2014_v15 = vsel %vm2013_vm9, %v2012_v13, %v2563_v14 }
 0x7c3   :  { %2015 = vrot.lane.b32.xlu1 %v2014_v15, %s2566_s4 }
 0x835   :  { %v2016_v16 = vpop.permute.xlu1 %2015 }
 0x836   :  { %2019 = vst.msk [vmem:[%s3179_s5] sm:$0x3] %vm2018_vm10, %v2016_v16 }

</bundles_post_ra>
